<compile_context>
chip_gen: v7x
topology: tpu7x:2x2x1
jax: 0.10.0
libtpu: 0.0.40
codegen_flags: <defaults>
</compile_context>

<pallas_src>
import jax
import jax.numpy as jnp
from jax.experimental import pallas as pl
from jax.experimental.pallas import tpu as pltpu


def _rope_kernel(cos_ref, sin_ref, q_ref, k_ref, qo_ref, ko_ref):
    # cos/sin blocks: (Ts, half) f32;  q/k blocks: (1, Ts, D)
    half = cos_ref.shape[-1]

    cos = cos_ref[...]
    sin = sin_ref[...]

    q1 = q_ref[:, :, 0:half]
    q2 = q_ref[:, :, half:]
    k1 = k_ref[:, :, 0:half]
    k2 = k_ref[:, :, half:]

    # rotate_half(x) = concat(-x2, x1); torch's cos/sin tables repeat their
    # first half, so:
    #   out[..., :half] = x1*cos - x2*sin
    #   out[..., half:] = x2*cos + x1*sin
    qo_ref[:, :, 0:half] = (q1 * cos - q2 * sin).astype(qo_ref.dtype)
    qo_ref[:, :, half:] = (q2 * cos + q1 * sin).astype(qo_ref.dtype)
    ko_ref[:, :, 0:half] = (k1 * cos - k2 * sin).astype(ko_ref.dtype)
    ko_ref[:, :, half:] = (k2 * cos + k1 * sin).astype(ko_ref.dtype)


def _pick_seq_tile(S, D, itemsize):
    """Pick a sequence tile so each (1, Ts, D) block is ~1 MiB, Ts % 8 == 0."""
    target_rows = max(8, (1 << 20) // max(1, D * itemsize))
    ts = min(S, target_rows)
    if ts >= 8:
        ts -= ts % 8
    return max(1, min(ts, S))


def rotary_positional_encoding(q, k, max_seq_length=512):
    """Apply RoPE to q and k. q, k: (B, S, D). Returns (q_embed, k_embed).

    `max_seq_length` is kept for signature parity with the PyTorch module but
    (like the PyTorch forward) the tables are built from the actual S.
    """
    B, S, D = q.shape
    assert k.shape == (B, S, D)
    assert D % 2 == 0
    half = D // 2

    # Table setup (plain JAX, f32) — matches torch __init__ + _get_rotary_embeddings.
    # cos/sin of cat([freqs, freqs]) repeat their first half, so only the
    # half-width tables are needed.
    inv_freq = 1.0 / (10000.0 ** (jnp.arange(0, D, 2, dtype=jnp.float32) / D))  # (half,)
    t = jnp.arange(S, dtype=jnp.float32)                                        # (S,)
    freqs = jnp.einsum('i,j->ij', t, inv_freq)                                  # (S, half)
    cos_h = jnp.cos(freqs)
    sin_h = jnp.sin(freqs)

    itemsize = jnp.dtype(q.dtype).itemsize
    ts = _pick_seq_tile(S, D, itemsize)
    num_seq_tiles = pl.cdiv(S, ts)

    # VMEM budget: double-buffered q, k, qo, ko blocks + double-buffered
    # cos/sin tiles, with ~2x headroom (min 16 MiB, capped at 64 MiB so the
    # same setting is valid on v7x's smaller physical VMEM).
    block_bytes = ts * D * itemsize
    table_bytes = ts * half * 4
    needed = 2 * (4 * block_bytes + 2 * table_bytes)
    vmem_limit = int(min(64 * (1 << 20), max(2 * needed, 16 * (1 << 20))))

    out_shape = (
        jax.ShapeDtypeStruct((B, S, D), q.dtype),
        jax.ShapeDtypeStruct((B, S, D), k.dtype),
    )

    # Grid: seq tiles outer, batch inner -> cos/sin tile stays resident across
    # the whole batch sweep.
    grid_spec = pltpu.PrefetchScalarGridSpec(
        num_scalar_prefetch=0,
        grid=(num_seq_tiles, B),
        in_specs=[
            pl.BlockSpec((ts, half), lambda s, b: (s, 0)),     # cos (half-table)
            pl.BlockSpec((ts, half), lambda s, b: (s, 0)),     # sin (half-table)
            pl.BlockSpec((1, ts, D), lambda s, b: (b, s, 0)),  # q
            pl.BlockSpec((1, ts, D), lambda s, b: (b, s, 0)),  # k
        ],
        out_specs=[
            pl.BlockSpec((1, ts, D), lambda s, b: (b, s, 0)),  # q_embed
            pl.BlockSpec((1, ts, D), lambda s, b: (b, s, 0)),  # k_embed
        ],
    )

    q_embed, k_embed = pl.pallas_call(
        _rope_kernel,
        out_shape=out_shape,
        grid_spec=grid_spec,
        compiler_params=pltpu.CompilerParams(
            dimension_semantics=("parallel", "parallel"),
            vmem_limit_bytes=vmem_limit,
        ),
    )(cos_h, sin_h, q, k)
    return q_embed, k_embed


def _rope_reference(q, k):
    """Pure-JAX reference mirroring the PyTorch forward exactly."""
    B, S, D = q.shape
    inv_freq = 1.0 / (10000.0 ** (jnp.arange(0, D, 2, dtype=jnp.float32) / D))
    t = jnp.arange(S, dtype=jnp.float32)
    freqs = jnp.einsum('i,j->ij', t, inv_freq)
    emb = jnp.concatenate([freqs, freqs], axis=-1)
    cos, sin = jnp.cos(emb), jnp.sin(emb)

    def rotate_half(x):
        half = x.shape[-1] // 2
        return jnp.concatenate([-x[..., half:], x[..., :half]], axis=-1)

    return q * cos + rotate_half(q) * sin, k * cos + rotate_half(k) * sin


if __name__ == "__main__":
    key = jax.random.PRNGKey(0)
    kq, kk = jax.random.split(key)
    B, S, D = 2, 8, 32
    q = jax.random.normal(kq, (B, S, D), dtype=jnp.float32)
    k = jax.random.normal(kk, (B, S, D), dtype=jnp.float32)

    q_out, k_out = rotary_positional_encoding(q, k)
    jax.block_until_ready((q_out, k_out))

    q_ref, k_ref = _rope_reference(q, k)
    assert jnp.allclose(q_out, q_ref, atol=1e-5, rtol=1e-5)
    assert jnp.allclose(k_out, k_ref, atol=1e-5, rtol=1e-5)

    print("KERNEL_OK")
</pallas_src>

<mosaic_0001>
module attributes {stable_mosaic.version = 11 : i64} {
  func.func @_rope_kernel(%arg0: i32, %arg1: i32, %arg2: memref<8x16xf32, #tpu.memory_space<vmem>>, %arg3: memref<8x16xf32, #tpu.memory_space<vmem>>, %arg4: memref<1x8x32xf32, #tpu.memory_space<vmem>>, %arg5: memref<1x8x32xf32, #tpu.memory_space<vmem>>, %arg6: memref<1x8x32xf32, #tpu.memory_space<vmem>>, %arg7: memref<1x8x32xf32, #tpu.memory_space<vmem>>) attributes {dimension_semantics = [#tpu.dimension_semantics<parallel>, #tpu.dimension_semantics<parallel>], iteration_bounds = array<i64: 1, 2>, scalar_prefetch = 0 : i64, scratch_operands = 0 : i64, tpu.core_type = #tpu.core_type<tc>, window_params = [{transform_indices = @transform_0, window_bounds = array<i64: 8, 16>}, {transform_indices = @transform_1, window_bounds = array<i64: 8, 16>}, {transform_indices = @transform_2, window_bounds = array<i64: 1, 8, 32>}, {transform_indices = @transform_3, window_bounds = array<i64: 1, 8, 32>}, {transform_indices = @transform_4, window_bounds = array<i64: 1, 8, 32>}, {transform_indices = @transform_5, window_bounds = array<i64: 1, 8, 32>}]} {
    %c0 = arith.constant 0 : index
    %c0_0 = arith.constant 0 : index
    %0 = vector.load %arg2[%c0, %c0_0] : memref<8x16xf32, #tpu.memory_space<vmem>>, vector<8x16xf32>
    %c0_1 = arith.constant 0 : index
    %c0_2 = arith.constant 0 : index
    %1 = vector.load %arg3[%c0_1, %c0_2] : memref<8x16xf32, #tpu.memory_space<vmem>>, vector<8x16xf32>
    %c0_3 = arith.constant 0 : index
    %c0_4 = arith.constant 0 : index
    %c0_5 = arith.constant 0 : index
    %2 = vector.load %arg4[%c0_3, %c0_4, %c0_5] : memref<1x8x32xf32, #tpu.memory_space<vmem>>, vector<1x8x16xf32>
    %c0_6 = arith.constant 0 : index
    %c0_7 = arith.constant 0 : index
    %c16 = arith.constant 16 : index
    %3 = vector.load %arg4[%c0_6, %c0_7, %c16] : memref<1x8x32xf32, #tpu.memory_space<vmem>>, vector<1x8x16xf32>
    %c0_8 = arith.constant 0 : index
    %c0_9 = arith.constant 0 : index
    %c0_10 = arith.constant 0 : index
    %4 = vector.load %arg5[%c0_8, %c0_9, %c0_10] : memref<1x8x32xf32, #tpu.memory_space<vmem>>, vector<1x8x16xf32>
    %c0_11 = arith.constant 0 : index
    %c0_12 = arith.constant 0 : index
    %c16_13 = arith.constant 16 : index
    %5 = vector.load %arg5[%c0_11, %c0_12, %c16_13] : memref<1x8x32xf32, #tpu.memory_space<vmem>>, vector<1x8x16xf32>
    %6 = vector.shape_cast %0 : vector<8x16xf32> to vector<1x8x16xf32>
    %7 = arith.mulf %2, %6 : vector<1x8x16xf32>
    %8 = vector.shape_cast %1 : vector<8x16xf32> to vector<1x8x16xf32>
    %9 = arith.mulf %3, %8 : vector<1x8x16xf32>
    %10 = arith.subf %7, %9 : vector<1x8x16xf32>
    %c0_14 = arith.constant 0 : index
    %c0_15 = arith.constant 0 : index
    %c0_16 = arith.constant 0 : index
    %11 = vector.load %arg6[%c0_14, %c0_15, %c0_16] : memref<1x8x32xf32, #tpu.memory_space<vmem>>, vector<1x8x16xf32>
    tpu.vector_store %arg6[%c0_14, %c0_15, %c0_16], %10 {strides = array<i32>} : memref<1x8x32xf32, #tpu.memory_space<vmem>>, vector<1x8x16xf32>,
    %12 = vector.shape_cast %0 : vector<8x16xf32> to vector<1x8x16xf32>
    %13 = arith.mulf %3, %12 : vector<1x8x16xf32>
    %14 = vector.shape_cast %1 : vector<8x16xf32> to vector<1x8x16xf32>
    %15 = arith.mulf %2, %14 : vector<1x8x16xf32>
    %16 = arith.addf %13, %15 : vector<1x8x16xf32>
    %c0_17 = arith.constant 0 : index
    %c0_18 = arith.constant 0 : index
    %c16_19 = arith.constant 16 : index
    %17 = vector.load %arg6[%c0_17, %c0_18, %c16_19] : memref<1x8x32xf32, #tpu.memory_space<vmem>>, vector<1x8x16xf32>
    tpu.vector_store %arg6[%c0_17, %c0_18, %c16_19], %16 {strides = array<i32>} : memref<1x8x32xf32, #tpu.memory_space<vmem>>, vector<1x8x16xf32>,
    %18 = vector.shape_cast %0 : vector<8x16xf32> to vector<1x8x16xf32>
    %19 = arith.mulf %4, %18 : vector<1x8x16xf32>
    %20 = vector.shape_cast %1 : vector<8x16xf32> to vector<1x8x16xf32>
    %21 = arith.mulf %5, %20 : vector<1x8x16xf32>
    %22 = arith.subf %19, %21 : vector<1x8x16xf32>
    %c0_20 = arith.constant 0 : index
    %c0_21 = arith.constant 0 : index
    %c0_22 = arith.constant 0 : index
    %23 = vector.load %arg7[%c0_20, %c0_21, %c0_22] : memref<1x8x32xf32, #tpu.memory_space<vmem>>, vector<1x8x16xf32>
    tpu.vector_store %arg7[%c0_20, %c0_21, %c0_22], %22 {strides = array<i32>} : memref<1x8x32xf32, #tpu.memory_space<vmem>>, vector<1x8x16xf32>,
    %24 = vector.shape_cast %0 : vector<8x16xf32> to vector<1x8x16xf32>
    %25 = arith.mulf %5, %24 : vector<1x8x16xf32>
    %26 = vector.shape_cast %1 : vector<8x16xf32> to vector<1x8x16xf32>
    %27 = arith.mulf %4, %26 : vector<1x8x16xf32>
    %28 = arith.addf %25, %27 : vector<1x8x16xf32>
    %c0_23 = arith.constant 0 : index
    %c0_24 = arith.constant 0 : index
    %c16_25 = arith.constant 16 : index
    %29 = vector.load %arg7[%c0_23, %c0_24, %c16_25] : memref<1x8x32xf32, #tpu.memory_space<vmem>>, vector<1x8x16xf32>
    tpu.vector_store %arg7[%c0_23, %c0_24, %c16_25], %28 {strides = array<i32>} : memref<1x8x32xf32, #tpu.memory_space<vmem>>, vector<1x8x16xf32>,
    return
  }
  func.func @transform_0(%arg0: i32, %arg1: i32) -> (i32, i32) {
    %c0_i32 = arith.constant 0 : i32
    %c0_i32_0 = arith.constant 0 : i32
    return %arg0, %c0_i32 : i32, i32
  }
  func.func @transform_1(%arg0: i32, %arg1: i32) -> (i32, i32) {
    %c0_i32 = arith.constant 0 : i32
    %c0_i32_0 = arith.constant 0 : i32
    return %arg0, %c0_i32 : i32, i32
  }
  func.func @transform_2(%arg0: i32, %arg1: i32) -> (i32, i32, i32) {
    %c0_i32 = arith.constant 0 : i32
    %c0_i32_0 = arith.constant 0 : i32
    return %arg1, %arg0, %c0_i32 : i32, i32, i32
  }
  func.func @transform_3(%arg0: i32, %arg1: i32) -> (i32, i32, i32) {
    %c0_i32 = arith.constant 0 : i32
    %c0_i32_0 = arith.constant 0 : i32
    return %arg1, %arg0, %c0_i32 : i32, i32, i32
  }
  func.func @transform_4(%arg0: i32, %arg1: i32) -> (i32, i32, i32) {
    %c0_i32 = arith.constant 0 : i32
    %c0_i32_0 = arith.constant 0 : i32
    return %arg1, %arg0, %c0_i32 : i32, i32, i32
  }
  func.func @transform_5(%arg0: i32, %arg1: i32) -> (i32, i32, i32) {
    %c0_i32 = arith.constant 0 : i32
    %c0_i32_0 = arith.constant 0 : i32
    return %arg1, %arg0, %c0_i32 : i32, i32, i32
  }
}

</mosaic_0001>

<bundles_post_ra>
// kernel: tpu_custom_call.1
= control target key start
LH: loop header
LB: loop body
LE: loop exit
PB: predicated region body
PF: predicated region fallthrough
CT: control target
= control target key end

     0   :  { %s1302_s0 = inlined_call_operand.hbm [shape: f32[8,16], index: 0, kind: input, shape index: {}]   ;;  %s1303_s1 = inlined_call_operand.hbm [shape: f32[8,16], index: 1, kind: input, shape index: {}]   ;;  %s1304_s2 = inlined_call_operand.hbm [shape: f32[2,8,32], index: 2, kind: input, shape index: {}]   ;;  %s1305_s3 = inlined_call_operand.hbm [shape: f32[2,8,32], index: 3, kind: input, shape index: {}]   ;;  %s1306_s4 = inlined_call_operand.hbm [shape: f32[2,8,32], index: 4, kind: output, shape index: {0}]   ;;  %s1307_s5 = inlined_call_operand.hbm [shape: f32[2,8,32], index: 5, kind: output, shape index: {1}]  }
   0x1   :  { %1318 = sst [smem:[#allocation19_spill]] %s1302_s0 }
   0x2   :  { %11 = vsyncpa [#allocation3], 0 }
   0x3   :  { %12 = vsyncpa [#allocation6], 0 }
   0x4   :  { %13 = vsyncpa [#allocation4], 0 }
   0x5   :  { %15 = vsyncpa [#allocation4 + $0x1], 0 }
   0x6   :  { %16 = vsyncpa [#allocation11], 0 }
   0x7   :  { %18 = vsyncpa [#allocation11 + $0x1], 0  ;;  %s977_s18 = smov 0   ;;  %s979_s19 = smov 0  }
   0x8   :  { %s981_s20 = smov 0   ;;  %s983_s21 = smov 0  }
   0x9   :  { %s985_s22 = smov 0   ;;  %s987_s23 = smov 0  }
   0xa LB: > { %s1008_s24 = sadd.s32 4294967295, %s937_s23   ;;  %s582_s25 = sadd.s32 4294967294, %s937_s23   ;;  %s937_s23 = sphi %s987_s23, %s24_s23   ;;  %s933_s22 = sphi %s985_s22, %s1352_s22   ;;  %s929_s21 = sphi %s983_s21, %s1351_s21   ;;  %s925_s20 = sphi %s981_s20, %s1350_s20   ;;  %s921_s19 = sphi %s979_s19, %s1349_s19   ;;  %s917_s18 = sphi %s977_s18, %s1348_s18  }
   0xb   : > { %p110_p0 = scmp.ne.s32.totalorder %s921_s19, %s917_s18  ;;  %p1308_p1 = scmp.eq.s32.totalorder %s1008_s24, 0 }
   0xc   : > { %p170_p3 = scmp.eq.s32.totalorder %s582_s25, 1  ;;  %p583_p5 = scmp.ge.s32.totalorder %s937_s23, 1 }
   0xd   : > { %p1017_p4 = por %p1308_p1, %p110_p0  ;;  %p205_p7 = scmp.lt.s32.totalorder %s937_s23, 3 }
   0xe   : > { %p1022_p6 = por %p170_p3, %p110_p0  ;;  %s939_s29 = smov [#allocation2]  }
   0xf   : > { %s1319_s26 = scalar_select %p1017_p4, 1, 0 }
  0x10   : > { %s1320_s27 = scalar_select %p1022_p6, 1, 0 }
  0x11   : > { %p1027_p8 = pnand %p583_p5, %p205_p7  ;;  %s220_s30 = sshll.u32 %s939_s29, 4  ;;  %s221_s30 = int_to_ptr.vmem [resolvable:$true] %s220_s30 }
  0x12   : > { %s33_s7 = sadd.s32 1, %s933_s22  ;;  %s97_s8 = sadd.s32 1, %s925_s20 }
  0x13   : > { %s1321_s28 = scalar_select %p1027_p8, 1, 0 }
  0x14   : > { %p620_p10 = pneg %p1027_p8  ;;  %p1042_p12 = scmp.ge.s32.totalorder %s33_s7, 2 }
  0x15   : > { %s1324_s0 = sld [smem:[#allocation19_spill]] }
  0x16   : > { %p1036_p11 = pnand %p620_p10, %p1308_p1 }
  0x17   : > { %s1323_s9 = scalar_select %p1042_p12, 1, 0 }
  0x18   : > { %p1313_p0 = pneg %p1036_p11 }
  0x1b   : > { %s699_s12 = scalar_lea.hbm %s1324_s0, 128 }
  0x1c   : > { %p700_p13 = scmp.ne.s32.totalorder %s1324_s0, %s699_s12  ;;  %p706_p7 = scmp.lt.u32.totalorder %s699_s12, %s1324_s0 }
  0x1e   : > { %p702_p3 = pnand %p1313_p0, %p700_p13 }
  0x20   : > { %p703_p5 = pneg %p702_p3 }
  0x22   : > { %p708_p10 = pnand %p706_p7, %p703_p5 }
  0x24   : > { %711 = shalt.err (!%p708_p10)
}
  0x25   : > { %s712_s17 = scalar_lea.vmem %s221_s30, 128  ;;  %p720_p6 = scmp.lt.s32.totalorder %s221_s30, %s221_s30 }
  0x26   : > { %p713_p9 = scmp.ne.s32.totalorder %s221_s30, %s712_s17  ;;  %p721_p4 = scmp.lt.s32.totalorder %s712_s17, %s712_s17 }
  0x28   : > { %p715_p1 = pnand %p713_p9, %p1313_p0  ;;  %p722_p8 = por %p721_p4, %p720_p6 }
  0x2a   : > { %p716_p2 = pneg %p715_p1 }
  0x2c   : > { %p723_p12 = pnand %p722_p8, %p716_p2 }
  0x2e   : > { %726 = shalt.err (!%p723_p12)
}
  0x2f   : > { %623 = dma.hbm_to_vmem [thread:$0]  (!%p1036_p11), %s1324_s0, 128, %s221_s30, [#allocation3]  }
  0x30   : > { %p1325_p1 = scmp.ne.s32.totalorder %s1323_s9, 0  ;;  %p104_p2 = scmp.ne.s32.totalorder %s925_s20, %s921_s19 }
  0x31   : > { %p105_p4 = scmp.eq.s32.totalorder %s937_s23, 0  ;;  %p643_p6 = scmp.lt.s32.totalorder %s937_s23, 2 }
  0x32   : > { %s1354_s7 = smov (%p1325_p1, %s33_s7), 0  ;;  %p1327_p12 = scmp.eq.s32.totalorder %s1008_s24, 1 }
  0x33   : > { %1326 = sst [smem:[#allocation17_spill]] %s1354_s7  ;;  %s92_s10 = ssub.s32 %s933_s22, %s1354_s7 }
  0x34   : > { %p95_p8 = scmp.eq.s32.totalorder %s92_s10, 0  ;;  %p106_p9 = por %p105_p4, %p104_p2 }
  0x35   : > { %p1080_p13 = por %p1327_p12, %p104_p2  ;;  %s244_s12 = sand.u32 1, %s937_s23  }
  0x36   : > { %s1088_s13 = scalar_select %p95_p8, %s925_s20, %s97_s8  }
  0x37   : > { %s1328_s11 = scalar_select %p1080_p13, 1, 0 }
  0x38   : > { %1329 = sst [smem:[#allocation18_spill]] %s1088_s13  ;;  %s246_s30 = sand.u32 1, %s925_s20  }
  0x39   : > { %s1091_s9 = sshll.u32 %s246_s30, 3  ;;  %s1311_s14 = sshll.u32 %s933_s22, 7 }
  0x3a   : > { %s1099_s17 = scalar_lea.hbm %s1304_s2, %s1311_s14  ;;  %s248_s25 = scalar_lea.vmem [#allocation7], %s1091_s9 }
  0x3b   : > { %s256_s29 = sshll.u32 %s248_s25, 4  ;;  %p1102_p3 = pnand %p643_p6, %p106_p9  ;;  %s1106_s29 = int_to_ptr.vmem [resolvable:$true] %s256_s29 }
  0x3c   : > { %s940_s10 = smov [#allocation5]   ;;  %s1110_s15 = scalar_lea.sflag [#allocation3], %s244_s12 }
  0x3d   : > { %s1330_s8 = scalar_select %p1102_p3, 1, 0 }
  0x3e   : > { %s1108_s30 = sshll.u32 %s940_s10, 4  ;;  %s727_s16 = scalar_lea.hbm %s1099_s17, 128  ;;  %s234_s30 = int_to_ptr.vmem [resolvable:$true] %s1108_s30 }
  0x3f   : > { %p728_p5 = scmp.ne.s32.totalorder %s1099_s17, %s727_s16  ;;  %p1315_p7 = pneg %p1102_p3 }
  0x40   : > { %s732_s0 = scalar_lea.hbm %s1304_s2, 256  ;;  %p733_p2 = scmp.lt.u32.totalorder %s1099_s17, %s1304_s2 }
  0x41   : > { %p730_p10 = pnand %p1315_p7, %p728_p5  ;;  %p734_p4 = scmp.lt.u32.totalorder %s732_s0, %s727_s16 }
  0x42   : > { %p736_p8 = scmp.lt.u32.totalorder %s727_s16, %s1099_s17 }
  0x43   : > { %p731_p1 = pneg %p730_p10  ;;  %p735_p6 = por %p734_p4, %p733_p2 }
  0x45   : > { %p737_p9 = por %p736_p8, %p735_p6 }
  0x47   : > { %p738_p12 = pnand %p737_p9, %p731_p1 }
  0x49   : > { %741 = shalt.err (!%p738_p12)
}
  0x4a   : > { %s742_s12 = scalar_lea.vmem %s1106_s29, 128  ;;  %s941_s14 = smov [#allocation7]  }
  0x4b   : > { %p743_p5 = scmp.ne.s32.totalorder %s1106_s29, %s742_s12  ;;  %s747_s10 = sshll.u32 %s941_s14, 4  ;;  %s748_s10 = int_to_ptr.vmem [resolvable:$false] %s747_s10 }
  0x4c   : > { %s749_s7 = scalar_lea.vmem %s748_s10, 256  ;;  %p750_p13 = scmp.lt.s32.totalorder %s1106_s29, %s748_s10 }
  0x4d   : > { %p745_p10 = pnand %p743_p5, %p1315_p7  ;;  %p751_p2 = scmp.lt.s32.totalorder %s749_s7, %s742_s12 }
  0x4f   : > { %p746_p0 = pneg %p745_p10  ;;  %p752_p4 = por %p751_p2, %p750_p13 }
  0x51   : > { %p753_p6 = pnand %p752_p4, %p746_p0 }
  0x53   : > { %756 = shalt.err (!%p753_p6)
}
  0x54   : > { %630 = dma.hbm_to_vmem [thread:$0]  (!%p1102_p3), %s1099_s17, 128, %s1106_s29, %s1110_s15  }
  0x55   : > { %s757_s16 = scalar_lea.hbm %s1303_s1, 128  ;;  %p1331_p0 = pneg %p1036_p11 }
  0x56   : > { %p758_p1 = scmp.ne.s32.totalorder %s1303_s1, %s757_s16  ;;  %p764_p9 = scmp.lt.u32.totalorder %s757_s16, %s1303_s1 }
  0x58   : > { %p760_p13 = pnand %p758_p1, %p1331_p0 }
  0x5a   : > { %p761_p8 = pneg %p760_p13 }
  0x5c   : > { %p766_p12 = pnand %p764_p9, %p761_p8 }
  0x5e   : > { %769 = shalt.err (!%p766_p12)
}
  0x5f   : > { %s770_s17 = scalar_lea.vmem %s234_s30, 128  ;;  %p1332_p10 = pmov %p1331_p0 }
  0x60   : > { %p771_p5 = scmp.ne.s32.totalorder %s234_s30, %s770_s17  ;;  %p778_p6 = scmp.lt.s32.totalorder %s234_s30, %s234_s30 }
  0x61   : > { %p779_p7 = scmp.lt.s32.totalorder %s770_s17, %s770_s17 }
  0x62   : > { %p773_p2 = pnand %p771_p5, %p1332_p10 }
  0x63   : > { %p780_p3 = por %p779_p7, %p778_p6 }
  0x64   : > { %p774_p4 = pneg %p773_p2 }
  0x66   : > { %p781_p0 = pnand %p780_p3, %p774_p4 }
  0x68   : > { %784 = shalt.err (!%p781_p0)
}
  0x69   : > { %626 = dma.hbm_to_vmem [thread:$0]  (!%p1036_p11), %s1303_s1, 128, %s234_s30, [#allocation6]  }
  0x6a   : > { %s1333_s0 = sshll.u32 %s933_s22, 7  ;;  %s267_s14 = scalar_lea.vmem [#allocation8], %s1091_s9 }
  0x6b   : > { %s1164_s25 = scalar_lea.hbm %s1305_s3, %s1333_s0  ;;  %s275_s12 = sshll.u32 %s267_s14, 4  ;;  %s276_s12 = int_to_ptr.vmem [resolvable:$true] %s275_s12 }
  0x6c   : > { %s785_s6 = scalar_lea.hbm %s1164_s25, 128  ;;  %p1334_p7 = scmp.ne.s32.totalorder %s1330_s8, 0 }
  0x6d   : > { %p786_p3 = scmp.ne.s32.totalorder %s1164_s25, %s785_s6  ;;  %s790_s17 = scalar_lea.hbm %s1305_s3, 256 }
  0x6e   : > { %p1335_p1 = pneg %p1334_p7  ;;  %p791_p11 = scmp.lt.u32.totalorder %s1164_s25, %s1305_s3 }
  0x6f   : > { %p792_p9 = scmp.lt.u32.totalorder %s790_s17, %s785_s6  ;;  %p794_p5 = scmp.lt.u32.totalorder %s785_s6, %s1164_s25 }
  0x70   : > { %p788_p13 = pnand %p786_p3, %p1335_p1 }
  0x71   : > { %p793_p12 = por %p792_p9, %p791_p11 }
  0x72   : > { %p789_p8 = pneg %p788_p13 }
  0x73   : > { %p795_p10 = por %p794_p5, %p793_p12 }
  0x75   : > { %p796_p2 = pnand %p795_p10, %p789_p8 }
  0x77   : > { %799 = shalt.err (!%p796_p2)
}
  0x78   : > { %s800_s9 = scalar_lea.vmem %s276_s12, 128  ;;  %p1336_p6 = pmov %p1335_p1 }
  0x79   : > { %p801_p4 = scmp.ne.s32.totalorder %s276_s12, %s800_s9  ;;  %s942_s0 = smov [#allocation8]  }
  0x7a   : > { %s805_s13 = sshll.u32 %s942_s0, 4  ;;  %s806_s13 = int_to_ptr.vmem [resolvable:$false] %s805_s13 }
  0x7b   : > { %p803_p0 = pnand %p801_p4, %p1336_p6  ;;  %s807_s16 = scalar_lea.vmem %s806_s13, 256 }
  0x7c   : > { %p808_p1 = scmp.lt.s32.totalorder %s276_s12, %s806_s13  ;;  %p809_p13 = scmp.lt.s32.totalorder %s807_s16, %s800_s9 }
  0x7d   : > { %p804_p3 = pneg %p803_p0 }
  0x7e   : > { %p810_p9 = por %p809_p13, %p808_p1 }
  0x80   : > { %p811_p11 = pnand %p810_p9, %p804_p3 }
  0x82   : > { %814 = shalt.err (!%p811_p11)
}
  0x83   : > { %633 = dma.hbm_to_vmem [thread:$0]  (!%p1334_p7), %s1164_s25, 128, %s276_s12, %s1110_s15  }
  0x84   : > { %p1337_p8 = scmp.ne.s32.totalorder %s1321_s28, 0 }
  0x85   : > { %p1338_p12 = scmp.eq.s32.totalorder (!%p1337_p8), %s1008_s24, 0 }
  0x86   : > { %284 = sbr.rel (%p1337_p8) target bundleno = 426 (0x1aa), region = 36 }
  0x8d   : > { %896 = dma.done.wait (%p1338_p12), [#allocation3], 128   ;;  %p1339_p5 = pmov %p1338_p12 }
  0x8f   : > { %898 = vsyncadd (%p1339_p5), [#allocation3], 4294967168  ;;  %p1340_p10 = pmov %p1339_p5 }
  0x90   : > { %p1341_p2 = pmov %p1339_p5 }
  0x91   : > { %900 = dma.done.wait (%p1340_p10), [#allocation6], 128  }
  0x92   : > { %902 = vsyncadd (%p1341_p2), [#allocation6], 4294967168  ;;  %s294_s8 = sand.u32 1, %s1008_s24   ;;  %s1199_s15 = sand.u32 1, %s921_s19  }
  0x93   : > { %s1202_s28 = sshll.u32 %s1199_s15, 3  ;;  %s295_s25 = scalar_lea.sflag [#allocation3], %s294_s8 }
  0x94   : > { %s298_s14 = scalar_lea.vmem [#allocation7], %s1202_s28  ;;  %p1342_p7 = scmp.ne.s32.totalorder %s1319_s26, 0 }
  0x96   : > { %904 = dma.done.wait (%p1342_p7), %s295_s25, 256  }
  0x97   : > { %906 = vsyncadd (%p1342_p7), %s295_s25, 4294967040  ;;  %v345_v0 = vld [vmem:[#allocation5] sm:$0xff]  ;;  %s943_s12 = smov 16   ;;  %v344_v1 = vld [vmem:[#allocation2] sm:$0xff]  ;;  %s307_s24 = scalar_lea.vmem [#allocation8], %s1202_s28  ;;  %vm359_vm0 = vcmask 130048  }
  0x98   : > { %350 = vrot.lane.b32.xlu0 %v345_v0, %s943_s12  ;;  %v346_v2 = vld [vmem:[%s298_s14] sm:$0xff]  ;;  %v347_v6 = vld [vmem:[%s307_s24] sm:$0xff]  ;;  %s944_s6 = smov 112   ;;  %s600_s26 = sshll.u32 %s929_s21, 7  ;;  %vm372_vm1 = vcmask 261248  }
  0x99   : > { %v366_v3 = vmul.f32 %v346_v2, %v345_v0  ;;  %v383_v8 = vmul.f32 %v347_v6, %v345_v0  ;;  %v348_v11 = vmul.f32 %v346_v2, %v344_v1  ;;  %s336_s30 = scalar_lea.vmem [#allocation9], %s1202_s28  ;;  %v374_v16 = vmul.f32 %v347_v6, %v344_v1  ;;  %s1217_s7 = scalar_lea.hbm %s1306_s4, %s600_s26 }
  0x9a   : > { %s410_s10 = sshll.u32 %s336_s30, 4  ;;  %s391_s9 = scalar_lea.sflag [#allocation4], %s1199_s15  ;;  %s1219_s10 = int_to_ptr.vmem [resolvable:$true] %s410_s10 }
  0x9b   : > { %s815_s0 = scalar_lea.vmem %s1219_s10, 128  ;;  %p1343_p6 = scmp.ne.s32.totalorder %s1328_s11, 0 }
  0x9c   : > { %362 = vrot.lane.b32.xlu0 %v344_v1, %s943_s12  ;;  %p816_p4 = scmp.ne.s32.totalorder %s1219_s10, %s815_s0  ;;  %s945_s13 = smov [#allocation9]  }
  0x9d   : > { %s819_s16 = sshll.u32 %s945_s13, 4  ;;  %s820_s16 = int_to_ptr.vmem [resolvable:$false] %s819_s16 }
  0x9e   : > { %p817_p0 = pnand %p816_p4, %p1343_p6  ;;  %s821_s8 = scalar_lea.vmem %s820_s16, 256 }
  0x9f   : > { %p822_p1 = scmp.lt.s32.totalorder %s1219_s10, %s820_s16  ;;  %p823_p13 = scmp.lt.s32.totalorder %s821_s8, %s815_s0 }
  0xa0   : > { %368 = vrot.lane.b32.xlu0 %v366_v3, %s943_s12  ;;  %p818_p3 = pneg %p817_p0 }
  0xa1   : > { %p824_p9 = por %p823_p13, %p822_p1 }
  0xa3   : > { %p825_p11 = pnand %p824_p9, %p818_p3 }
 0x10a   : > { %v351_v4 = vpop.permute.xlu0 %350 }
 0x10b   : > { %v353_v5 = vmul.f32 %v351_v4, %v346_v2  ;;  %v375_v7 = vmul.f32 %v351_v4, %v347_v6 }
 0x10d   : > { %355 = vrot.lane.b32.xlu1 %v353_v5, %s944_s6 }
 0x10e   : > { %v363_v9 = vpop.permute.xlu0 %362 }
 0x10f   : > { %v365_v10 = vmul.f32 %v363_v9, %v346_v2 }
 0x111   : > { %377 = vrot.lane.b32.xlu1 %v375_v7, %s944_s6 }
 0x112   : > { %v369_v12 = vpop.permute.xlu0 %368 }
 0x113   : > { %v371_v14 = vadd.f32 %v369_v12, %v365_v10 }
 0x115   : > { %385 = vrot.lane.b32.xlu1 %v383_v8, %s943_s12 }
 0x17f   : > { %v356_v13 = vpop.permute.xlu1 %355 }
 0x180   : > { %v358_v15 = vsub.f32 %v348_v11, %v356_v13 }
 0x182   : > { %360 = vst.msk [vmem:[%s336_s30] sm:$0xff] %vm359_vm0, %v358_v15 }
 0x183   : > { %v378_v17 = vpop.permute.xlu1 %377  ;;  %373 = vst.msk [vmem:[%s336_s30] sm:$0xff] %vm372_vm1, %v371_v14 }
 0x184   : > { %v380_v18 = vsub.f32 %v374_v16, %v378_v17 }
 0x185   : > { %828 = shalt.err (!%p825_p11)
}
 0x186   : > { %s829_s25 = scalar_lea.hbm %s1217_s7, 128  ;;  %s833_s24 = scalar_lea.hbm %s1306_s4, 256 }
 0x187   : > { %p830_p8 = scmp.ne.s32.totalorder %s1217_s7, %s829_s25  ;;  %p834_p10 = scmp.lt.u32.totalorder %s1217_s7, %s1306_s4 }
 0x188   : > { %p835_p2 = scmp.lt.u32.totalorder %s833_s24, %s829_s25  ;;  %p837_p4 = scmp.lt.u32.totalorder %s829_s25, %s1217_s7 }
 0x189   : > { %p831_p12 = pnand %p830_p8, %p1343_p6 }
 0x18a   : > { %p836_p7 = por %p835_p2, %p834_p10 }
 0x18b   : > { %p832_p5 = pneg %p831_p12 }
 0x18c   : > { %p838_p0 = por %p837_p4, %p836_p7 }
 0x18e   : > { %p839_p3 = pnand %p838_p0, %p832_p5 }
 0x190   : > { %842 = shalt.err (!%p839_p3)
}
 0x191   : > { %616 = dma.vmem_to_hbm [thread:$0]  (%p1343_p6), %s1219_s10, 128, %s1217_s7, %s391_s9   ;;  %v382_v19 = vmul.f32 %v363_v9, %v347_v6  ;;  %v386_v20 = vpop.permute.xlu1 %385 }
 0x192   : > { %s343_s17 = scalar_lea.vmem [#allocation10], %s1202_s28  ;;  %s1252_s16 = scalar_lea.hbm %s1307_s5, %s600_s26 }
 0x193   : > { %s424_s29 = sshll.u32 %s343_s17, 4  ;;  %381 = vst.msk [vmem:[%s343_s17] sm:$0xff] %vm359_vm0, %v380_v18  ;;  %v388_v21 = vadd.f32 %v386_v20, %v382_v19  ;;  %s396_s28 = scalar_lea.sflag [#allocation11], %s1199_s15  ;;  %s1254_s29 = int_to_ptr.vmem [resolvable:$true] %s424_s29 }
 0x194   : > { %s843_s10 = scalar_lea.vmem %s1254_s29, 128  ;;  %s946_s7 = smov [#allocation10]  }
 0x195   : > { %389 = vst.msk [vmem:[%s343_s17] sm:$0xff] %vm372_vm1, %v388_v21  ;;  %p844_p1 = scmp.ne.s32.totalorder %s1254_s29, %s843_s10  ;;  %s847_s21 = sshll.u32 %s946_s7, 4  ;;  %s848_s21 = int_to_ptr.vmem [resolvable:$false] %s847_s21 }
 0x196   : > { %s849_s9 = scalar_lea.vmem %s848_s21, 256  ;;  %p850_p11 = scmp.lt.s32.totalorder %s1254_s29, %s848_s21 }
 0x197   : > { %p845_p13 = pnand %p844_p1, %p1343_p6  ;;  %p851_p8 = scmp.lt.s32.totalorder %s849_s9, %s843_s10 }
 0x199   : > { %p846_p9 = pneg %p845_p13  ;;  %p852_p12 = por %p851_p8, %p850_p11 }
 0x19b   : > { %p853_p5 = pnand %p852_p12, %p846_p9 }
 0x19d   : > { %856 = shalt.err (!%p853_p5)
}
 0x19e   : > { %s857_s15 = scalar_lea.hbm %s1252_s16, 128  ;;  %s861_s25 = scalar_lea.hbm %s1307_s5, 256 }
 0x19f   : > { %p858_p10 = scmp.ne.s32.totalorder %s1252_s16, %s857_s15  ;;  %p862_p4 = scmp.lt.u32.totalorder %s1252_s16, %s1307_s5 }
 0x1a0   : > { %p863_p0 = scmp.lt.u32.totalorder %s861_s25, %s857_s15  ;;  %p865_p1 = scmp.lt.u32.totalorder %s857_s15, %s1252_s16 }
 0x1a1   : > { %p859_p2 = pnand %p858_p10, %p1343_p6 }
 0x1a2   : > { %p864_p3 = por %p863_p0, %p862_p4 }
 0x1a3   : > { %p860_p7 = pneg %p859_p2 }
 0x1a4   : > { %p866_p13 = por %p865_p1, %p864_p3 }
 0x1a6   : > { %p867_p9 = pnand %p866_p13, %p860_p7 }
 0x1a8   : > { %870 = shalt.err (!%p867_p9)
}
 0x1a9   : > { %617 = dma.vmem_to_hbm [thread:$0]  (%p1343_p6), %s1254_s29, 128, %s1252_s16, %s396_s28  }
 0x1aa PF: > { %s436_s24 = sand.u32 1, %s917_s18   ;;  %p1344_p11 = scmp.ne.s32.totalorder %s1320_s27, 0 }
 0x1ab   : > { %p1345_p8 = scmp.ge.s32.totalorder %s937_s23, 2  ;;  %s437_s6 = scalar_lea.sflag [#allocation4], %s436_s24 }
 0x1ad   : > { %p635_p12 = pnand %p1345_p8, %p1344_p11 }
 0x1af   : > { %908 = dma.done.wait (!%p635_p12), %s437_s6, 128  }
 0x1b0   : > { %910 = vsyncadd (!%p635_p12), %s437_s6, 4294967168  ;;  %s446_s30 = scalar_lea.sflag [#allocation11], %s436_s24 }
 0x1b1   : > { %912 = dma.done.wait (!%p635_p12), %s446_s30, 128  }
 0x1b2   : > { %914 = vsyncadd (!%p635_p12), %s446_s30, 4294967168  ;;  %s24_s23 = sadd.s32 1, %s937_s23   ;;  %s1346_s11 = sld [smem:[#allocation18_spill]] }
 0x1b3   : > { %p21_p5 = scmp.ge.s32.totalorder %s24_s23, 4   ;;  %s1347_s17 = sld [smem:[#allocation17_spill]] }
 0x1b4   : > { %s1348_s18 = smov %s921_s19  ;;  %s1349_s19 = smov %s925_s20 }
 0x1b5   : > { %s1351_s21 = smov %s933_s22  ;;  %23 = sbr.rel (!%p21_p5) target bundleno = 10 (0xa), region = 118 }
 0x1b8   : > { %s1350_s20 = smov %s1346_s11 }
 0x1b9   : > { %s1352_s22 = smov %s1347_s17 }
 0x1bc   :  { %451 = vsyncpa [#allocation3], 1 }
 0x1bd   :  { %453 = vsyncpa [#allocation3 + $0x1], 1 }
 0x1be   :  { %454 = vsyncpa [#allocation6], 1 }
 0x1bf   :  { %455 = vsyncpa [#allocation4], 1 }
 0x1c0   :  { %457 = vsyncpa [#allocation4 + $0x1], 1 }
 0x1c1   :  { %458 = vsyncpa [#allocation11], 1 }
 0x1c2   :  { %460 = vsyncpa [#allocation11 + $0x1], 1 }

</bundles_post_ra>
